<compile_context>
chip_gen: v7x
topology: tpu7x:2x2x1
jax: 0.10.0
libtpu: 0.0.40
codegen_flags: <defaults>
</compile_context>

<pallas_src>
import functools

import jax
import jax.numpy as jnp
import numpy as np
from jax import lax
from jax.experimental import pallas as pl
from jax.experimental.pallas import tpu as pltpu


# ----------------------------------------------------------------------------
# Fused kernel: row-im2col into VMEM scratch -> one MXU matmul (whole batch) ->
# train-mode BN statistics (two-pass) -> scale/shift + ReLU -> lane-dense store.
# ----------------------------------------------------------------------------
def _fused_conv_bn_relu_kernel(x_ref, w_ref, gamma_ref, beta_ref, s_ref, st_ref,
                               o_ref, x2col_ref,
                               *, N, H, W, Cin, Cout, KH, eps, use_bf16):
    pad = KH // 2
    WPC = (W + 2 * pad) * Cin          # one zero-padded image row, channel-minor
    WC = W * Cout                      # lane-dense output row width (= 128 here)

    # ---- build the row-wise im2col matrix in VMEM (zeros = "same" padding) ----
    x2col_ref[...] = jnp.zeros_like(x2col_ref)
    for n in range(N):                 # static; whole batch handled in one step
        for kh in range(KH):
            dst_lo = max(0, pad - kh)
            dst_hi = H - max(0, kh - pad)
            src_lo = max(0, kh - pad)
            src_hi = H - max(0, pad - kh)
            x2col_ref[n * H + dst_lo:n * H + dst_hi,
                      kh * WPC + pad * Cin:kh * WPC + (W + pad) * Cin] = (
                          x_ref[n, src_lo:src_hi, :])

    # ---- one MXU matmul for the conv of the whole batch ----
    x2col = x2col_ref[...]             # (N*H, KH*WPC)
    w_big = w_ref[...]                 # (KH*WPC, W*Cout)
    if use_bf16:                       # v6e/v7x: bf16 MXU inputs, f32 accumulate
        x2col = x2col.astype(jnp.bfloat16)
        w_big = w_big.astype(jnp.bfloat16)
    y = jnp.dot(x2col, w_big, preferred_element_type=jnp.float32)  # (N*H, WC)

    # ---- BatchNorm2d training-mode statistics over (N, H, W), two-pass ----
    count = jnp.float32(N * H * W)
    s = s_ref[...]                     # (WC, Cout): lane -> channel reduction
    st = st_ref[...]                   # (Cout, WC): channel -> lane broadcast
    mean_c = jnp.dot(jnp.sum(y, axis=0, keepdims=True), s,
                     preferred_element_type=jnp.float32) / count     # (1, Cout)
    mean_l = jnp.dot(mean_c, st, preferred_element_type=jnp.float32)  # (1, WC)
    centered = y - mean_l
    var_c = jnp.dot(jnp.sum(centered * centered, axis=0, keepdims=True), s,
                    preferred_element_type=jnp.float32) / count       # (1, Cout)
    scale_c = gamma_ref[...] * lax.rsqrt(var_c + eps)                  # (1, Cout)
    scale_l = jnp.dot(scale_c, st, preferred_element_type=jnp.float32)
    beta_l = jnp.dot(beta_ref[...], st, preferred_element_type=jnp.float32)

    # ---- fused BN + ReLU, lane-dense (unmasked) store ----
    o_ref[...] = jnp.maximum(centered * scale_l + beta_l, 0.0)


def _block_toeplitz_weights(w_hwio, W):
    """Rearrange (KH,KW,Cin,Cout) into (KH*(W+2*pad)*Cin, W*Cout) so the conv of a
    row-im2col matrix becomes a single matmul with a lane-dense output."""
    KH, KW, Cin, Cout = w_hwio.shape
    pad = KH // 2
    WPC = (W + 2 * pad) * Cin
    w_big = jnp.zeros((KH * WPC, W * Cout), dtype=w_hwio.dtype)
    w_idx = jnp.arange(W)
    ci_idx = jnp.arange(Cin)
    c_idx = jnp.arange(Cout)
    for kh in range(KH):
        for kw in range(KW):
            rows = (kh * WPC + (w_idx[:, None, None] + kw) * Cin
                    + ci_idx[None, :, None])                    # (W, Cin, 1)
            cols = w_idx[:, None, None] * Cout + c_idx[None, None, :]  # (W, 1, Cout)
            vals = jnp.broadcast_to(w_hwio[kh, kw][None, :, :], (W, Cin, Cout))
            w_big = w_big.at[rows, cols].set(vals)
    return w_big


def same_block_2d(x_nhwc, w_hwio, bias, gamma, beta, eps=1e-5,
                  use_bf16_matmul=False):
    """x_nhwc: (N,H,W,Cin) f32; w_hwio: (KH,KW,Cin,Cout); bias/gamma/beta: (Cout,)."""
    N, H, W, Cin = x_nhwc.shape
    KH, KW, _, Cout = w_hwio.shape
    assert KH == KW and KH % 2 == 1
    pad = KH // 2
    WPC = (W + 2 * pad) * Cin
    WC = W * Cout

    # A per-channel bias added before train-mode BatchNorm cancels exactly
    # (mean absorbs it, variance unchanged) -> drop it entirely.
    del bias

    x_rows = x_nhwc.reshape(N, H, W * Cin)           # free, contiguous reshape
    w_big = _block_toeplitz_weights(w_hwio, W)        # (KH*WPC, WC)
    eye = jnp.eye(Cout, dtype=jnp.float32)
    s_mat = jnp.tile(eye, (W, 1))                     # (WC, Cout)
    st_mat = jnp.tile(eye, (1, W))                    # (Cout, WC)
    gamma2 = gamma.reshape(1, Cout).astype(jnp.float32)
    beta2 = beta.reshape(1, Cout).astype(jnp.float32)

    kernel = functools.partial(
        _fused_conv_bn_relu_kernel, N=N, H=H, W=W, Cin=Cin, Cout=Cout, KH=KH,
        eps=float(eps), use_bf16=use_bf16_matmul)

    # TODO(synk): for production sizes (e.g. 256x256x64 on v7x's 64 MiB VMEM) tile
    # over H-strips with a "parallel" grid axis instead of the single whole-batch block.
    out = pl.pallas_call(
        kernel,
        out_shape=jax.ShapeDtypeStruct((N * H, WC), jnp.float32),
        grid_spec=pltpu.PrefetchScalarGridSpec(
            num_scalar_prefetch=0,
            grid=(1,),
            in_specs=[
                pl.BlockSpec((N, H, W * Cin), lambda i: (0, 0, 0)),
                pl.BlockSpec((KH * WPC, WC), lambda i: (0, 0)),
                pl.BlockSpec((1, Cout), lambda i: (0, 0)),
                pl.BlockSpec((1, Cout), lambda i: (0, 0)),
                pl.BlockSpec((WC, Cout), lambda i: (0, 0)),
                pl.BlockSpec((Cout, WC), lambda i: (0, 0)),
            ],
            out_specs=pl.BlockSpec((N * H, WC), lambda i: (0, 0)),
            scratch_shapes=[pltpu.VMEM((N * H, KH * WPC), jnp.float32)],
        ),
        compiler_params=pltpu.CompilerParams(
            dimension_semantics=("arbitrary",)),
    )(x_rows, w_big, gamma2, beta2, s_mat, st_mat)

    return out.reshape(N, H, W, Cout)                 # back to NHWC (free reshape)


def _reference(x_nhwc, w_hwio, bias, gamma, beta, eps=1e-5):
    y = lax.conv_general_dilated(
        x_nhwc, w_hwio, window_strides=(1, 1), padding="SAME",
        dimension_numbers=("NHWC", "HWIO", "NHWC"))
    y = y + bias
    mean = jnp.mean(y, axis=(0, 1, 2))
    var = jnp.mean((y - mean) ** 2, axis=(0, 1, 2))
    y = (y - mean) / jnp.sqrt(var + eps) * gamma + beta
    return jnp.maximum(y, 0.0)


if __name__ == "__main__":
    key = jax.random.PRNGKey(0)
    N, Cin, Cout, H, W, K = 2, 4, 8, 16, 16, 3

    k1, k2, k3 = jax.random.split(key, 3)
    # PyTorch input would be NCHW (2, 4, 16, 16); we build it NHWC directly.
    x = jax.random.normal(k1, (N, H, W, Cin), dtype=jnp.float32)
    w = jax.random.normal(k2, (K, K, Cin, Cout), dtype=jnp.float32) * 0.1
    b = jax.random.normal(k3, (Cout,), dtype=jnp.float32) * 0.1
    gamma = jnp.ones((Cout,), dtype=jnp.float32)   # BatchNorm2d affine weight init
    beta = jnp.zeros((Cout,), dtype=jnp.float32)   # BatchNorm2d affine bias init

    out = same_block_2d(x, w, b, gamma, beta)
    out = jax.block_until_ready(out)

    ref = _reference(x, w, b, gamma, beta)
    np.testing.assert_allclose(np.asarray(out), np.asarray(ref),
                               rtol=1e-4, atol=1e-4)
    print("KERNEL_OK")
</pallas_src>

<mosaic_0001>
module attributes {stable_mosaic.version = 11 : i64} {
  func.func @_fused_conv_bn_relu_kernel(%arg0: i32, %arg1: memref<2x16x64xf32, #tpu.memory_space<vmem>>, %arg2: memref<216x128xf32, #tpu.memory_space<vmem>>, %arg3: memref<1x8xf32, #tpu.memory_space<vmem>>, %arg4: memref<1x8xf32, #tpu.memory_space<vmem>>, %arg5: memref<128x8xf32, #tpu.memory_space<vmem>>, %arg6: memref<8x128xf32, #tpu.memory_space<vmem>>, %arg7: memref<32x128xf32, #tpu.memory_space<vmem>>, %arg8: memref<32x216xf32, #tpu.memory_space<vmem>>) attributes {dimension_semantics = [#tpu.dimension_semantics<arbitrary>], iteration_bounds = array<i64: 1>, scalar_prefetch = 0 : i64, scratch_operands = 1 : i64, tpu.core_type = #tpu.core_type<tc>, window_params = [{pipeline_mode = #tpu.pipeline_mode<synchronous>, transform_indices = @transform_0, window_bounds = array<i64: 2, 16, 64>}, {pipeline_mode = #tpu.pipeline_mode<synchronous>, transform_indices = @transform_1, window_bounds = array<i64: 216, 128>}, {pipeline_mode = #tpu.pipeline_mode<synchronous>, transform_indices = @transform_2, window_bounds = array<i64: 1, 8>}, {pipeline_mode = #tpu.pipeline_mode<synchronous>, transform_indices = @transform_3, window_bounds = array<i64: 1, 8>}, {pipeline_mode = #tpu.pipeline_mode<synchronous>, transform_indices = @transform_4, window_bounds = array<i64: 128, 8>}, {pipeline_mode = #tpu.pipeline_mode<synchronous>, transform_indices = @transform_5, window_bounds = array<i64: 8, 128>}, {pipeline_mode = #tpu.pipeline_mode<synchronous>, transform_indices = @transform_6, window_bounds = array<i64: 32, 128>}]} {
    %cst = arith.constant 0.000000e+00 : f32
    %0 = vector.broadcast %cst : f32 to vector<32x216xf32>
    %c0 = arith.constant 0 : index
    %c0_0 = arith.constant 0 : index
    %1 = vector.load %arg8[%c0, %c0_0] : memref<32x216xf32, #tpu.memory_space<vmem>>, vector<32x216xf32>
    tpu.vector_store %arg8[%c0, %c0_0], %0 {strides = array<i32>} : memref<32x216xf32, #tpu.memory_space<vmem>>, vector<32x216xf32>,
    %c0_1 = arith.constant 0 : index
    %c0_2 = arith.constant 0 : index
    %c0_3 = arith.constant 0 : index
    %2 = vector.load %arg1[%c0_1, %c0_2, %c0_3] : memref<2x16x64xf32, #tpu.memory_space<vmem>>, vector<1x15x64xf32>
    %3 = vector.shape_cast %2 : vector<1x15x64xf32> to vector<15x64xf32>
    %c1 = arith.constant 1 : index
    %c4 = arith.constant 4 : index
    %4 = vector.load %arg8[%c1, %c4] : memref<32x216xf32, #tpu.memory_space<vmem>>, vector<15x64xf32>
    tpu.vector_store %arg8[%c1, %c4], %3 {strides = array<i32>} : memref<32x216xf32, #tpu.memory_space<vmem>>, vector<15x64xf32>,
    %c0_4 = arith.constant 0 : index
    %c0_5 = arith.constant 0 : index
    %c0_6 = arith.constant 0 : index
    %5 = vector.load %arg1[%c0_4, %c0_5, %c0_6] : memref<2x16x64xf32, #tpu.memory_space<vmem>>, vector<1x16x64xf32>
    %6 = vector.shape_cast %5 : vector<1x16x64xf32> to vector<16x64xf32>
    %c0_7 = arith.constant 0 : index
    %c76 = arith.constant 76 : index
    %7 = vector.load %arg8[%c0_7, %c76] : memref<32x216xf32, #tpu.memory_space<vmem>>, vector<16x64xf32>
    tpu.vector_store %arg8[%c0_7, %c76], %6 {strides = array<i32>} : memref<32x216xf32, #tpu.memory_space<vmem>>, vector<16x64xf32>,
    %c0_8 = arith.constant 0 : index
    %c1_9 = arith.constant 1 : index
    %c0_10 = arith.constant 0 : index
    %8 = vector.load %arg1[%c0_8, %c1_9, %c0_10] : memref<2x16x64xf32, #tpu.memory_space<vmem>>, vector<1x15x64xf32>
    %9 = vector.shape_cast %8 : vector<1x15x64xf32> to vector<15x64xf32>
    %c0_11 = arith.constant 0 : index
    %c148 = arith.constant 148 : index
    %10 = vector.load %arg8[%c0_11, %c148] : memref<32x216xf32, #tpu.memory_space<vmem>>, vector<15x64xf32>
    tpu.vector_store %arg8[%c0_11, %c148], %9 {strides = array<i32>} : memref<32x216xf32, #tpu.memory_space<vmem>>, vector<15x64xf32>,
    %c1_12 = arith.constant 1 : index
    %c0_13 = arith.constant 0 : index
    %c0_14 = arith.constant 0 : index
    %11 = vector.load %arg1[%c1_12, %c0_13, %c0_14] : memref<2x16x64xf32, #tpu.memory_space<vmem>>, vector<1x15x64xf32>
    %12 = vector.shape_cast %11 : vector<1x15x64xf32> to vector<15x64xf32>
    %c17 = arith.constant 17 : index
    %c4_15 = arith.constant 4 : index
    %13 = vector.load %arg8[%c17, %c4_15] : memref<32x216xf32, #tpu.memory_space<vmem>>, vector<15x64xf32>
    tpu.vector_store %arg8[%c17, %c4_15], %12 {strides = array<i32>} : memref<32x216xf32, #tpu.memory_space<vmem>>, vector<15x64xf32>,
    %c1_16 = arith.constant 1 : index
    %c0_17 = arith.constant 0 : index
    %c0_18 = arith.constant 0 : index
    %14 = vector.load %arg1[%c1_16, %c0_17, %c0_18] : memref<2x16x64xf32, #tpu.memory_space<vmem>>, vector<1x16x64xf32>
    %15 = vector.shape_cast %14 : vector<1x16x64xf32> to vector<16x64xf32>
    %c16 = arith.constant 16 : index
    %c76_19 = arith.constant 76 : index
    %16 = vector.load %arg8[%c16, %c76_19] : memref<32x216xf32, #tpu.memory_space<vmem>>, vector<16x64xf32>
    tpu.vector_store %arg8[%c16, %c76_19], %15 {strides = array<i32>} : memref<32x216xf32, #tpu.memory_space<vmem>>, vector<16x64xf32>,
    %c1_20 = arith.constant 1 : index
    %c1_21 = arith.constant 1 : index
    %c0_22 = arith.constant 0 : index
    %17 = vector.load %arg1[%c1_20, %c1_21, %c0_22] : memref<2x16x64xf32, #tpu.memory_space<vmem>>, vector<1x15x64xf32>
    %18 = vector.shape_cast %17 : vector<1x15x64xf32> to vector<15x64xf32>
    %c16_23 = arith.constant 16 : index
    %c148_24 = arith.constant 148 : index
    %19 = vector.load %arg8[%c16_23, %c148_24] : memref<32x216xf32, #tpu.memory_space<vmem>>, vector<15x64xf32>
    tpu.vector_store %arg8[%c16_23, %c148_24], %18 {strides = array<i32>} : memref<32x216xf32, #tpu.memory_space<vmem>>, vector<15x64xf32>,
    %c0_25 = arith.constant 0 : index
    %c0_26 = arith.constant 0 : index
    %20 = vector.load %arg8[%c0_25, %c0_26] : memref<32x216xf32, #tpu.memory_space<vmem>>, vector<32x216xf32>
    %c0_27 = arith.constant 0 : index
    %c0_28 = arith.constant 0 : index
    %21 = vector.load %arg2[%c0_27, %c0_28] : memref<216x128xf32, #tpu.memory_space<vmem>>, vector<216x128xf32>
    %cst_29 = arith.constant dense<0.000000e+00> : vector<32x128xf32>
    %22 = tpu.matmul %20, %21, %cst_29 {dimension_numbers = #tpu.dot_dimension_numbers<[1], [0], [0], [1], [0, 0, 1, 1], [], []>} : vector<32x216xf32>, vector<216x128xf32>, vector<32x128xf32> -> vector<32x128xf32>
    %c0_30 = arith.constant 0 : index
    %c0_31 = arith.constant 0 : index
    %23 = vector.load %arg5[%c0_30, %c0_31] : memref<128x8xf32, #tpu.memory_space<vmem>>, vector<128x8xf32>
    %c0_32 = arith.constant 0 : index
    %c0_33 = arith.constant 0 : index
    %24 = vector.load %arg6[%c0_32, %c0_33] : memref<8x128xf32, #tpu.memory_space<vmem>>, vector<8x128xf32>
    %cst_34 = arith.constant dense<0.000000e+00> : vector<128xf32>
    %25 = vector.multi_reduction <add>, %22, %cst_34 [0] : vector<32x128xf32> to vector<128xf32>
    %26 = vector.shape_cast %25 : vector<128xf32> to vector<1x128xf32>
    %cst_35 = arith.constant dense<0.000000e+00> : vector<1x8xf32>
    %27 = tpu.matmul %26, %23, %cst_35 {dimension_numbers = #tpu.dot_dimension_numbers<[1], [0], [0], [1], [0, 0, 1, 1], [], []>} : vector<1x128xf32>, vector<128x8xf32>, vector<1x8xf32> -> vector<1x8xf32>
    %cst_36 = arith.constant 5.120000e+02 : f32
    %28 = vector.broadcast %cst_36 : f32 to vector<1x8xf32>
    %29 = arith.divf %27, %28 : vector<1x8xf32>
    %cst_37 = arith.constant dense<0.000000e+00> : vector<1x128xf32>
    %30 = tpu.matmul %29, %24, %cst_37 {dimension_numbers = #tpu.dot_dimension_numbers<[1], [0], [0], [1], [0, 0, 1, 1], [], []>} : vector<1x8xf32>, vector<8x128xf32>, vector<1x128xf32> -> vector<1x128xf32>
    %31 = vector.broadcast %30 : vector<1x128xf32> to vector<32x128xf32>
    %32 = arith.subf %22, %31 : vector<32x128xf32>
    %33 = arith.mulf %32, %32 : vector<32x128xf32>
    %cst_38 = arith.constant dense<0.000000e+00> : vector<128xf32>
    %34 = vector.multi_reduction <add>, %33, %cst_38 [0] : vector<32x128xf32> to vector<128xf32>
    %35 = vector.shape_cast %34 : vector<128xf32> to vector<1x128xf32>
    %cst_39 = arith.constant dense<0.000000e+00> : vector<1x8xf32>
    %36 = tpu.matmul %35, %23, %cst_39 {dimension_numbers = #tpu.dot_dimension_numbers<[1], [0], [0], [1], [0, 0, 1, 1], [], []>} : vector<1x128xf32>, vector<128x8xf32>, vector<1x8xf32> -> vector<1x8xf32>
    %cst_40 = arith.constant 5.120000e+02 : f32
    %37 = vector.broadcast %cst_40 : f32 to vector<1x8xf32>
    %38 = arith.divf %36, %37 : vector<1x8xf32>
    %c0_41 = arith.constant 0 : index
    %c0_42 = arith.constant 0 : index
    %39 = vector.load %arg3[%c0_41, %c0_42] : memref<1x8xf32, #tpu.memory_space<vmem>>, vector<1x8xf32>
    %cst_43 = arith.constant 9.99999974E-6 : f32
    %40 = vector.broadcast %cst_43 : f32 to vector<1x8xf32>
    %41 = arith.addf %38, %40 : vector<1x8xf32>
    %42 = math.rsqrt %41 : vector<1x8xf32>
    %43 = arith.mulf %39, %42 : vector<1x8xf32>
    %cst_44 = arith.constant dense<0.000000e+00> : vector<1x128xf32>
    %44 = tpu.matmul %43, %24, %cst_44 {dimension_numbers = #tpu.dot_dimension_numbers<[1], [0], [0], [1], [0, 0, 1, 1], [], []>} : vector<1x8xf32>, vector<8x128xf32>, vector<1x128xf32> -> vector<1x128xf32>
    %c0_45 = arith.constant 0 : index
    %c0_46 = arith.constant 0 : index
    %45 = vector.load %arg4[%c0_45, %c0_46] : memref<1x8xf32, #tpu.memory_space<vmem>>, vector<1x8xf32>
    %cst_47 = arith.constant dense<0.000000e+00> : vector<1x128xf32>
    %46 = tpu.matmul %45, %24, %cst_47 {dimension_numbers = #tpu.dot_dimension_numbers<[1], [0], [0], [1], [0, 0, 1, 1], [], []>} : vector<1x8xf32>, vector<8x128xf32>, vector<1x128xf32> -> vector<1x128xf32>
    %47 = vector.broadcast %44 : vector<1x128xf32> to vector<32x128xf32>
    %48 = arith.mulf %32, %47 : vector<32x128xf32>
    %49 = vector.broadcast %46 : vector<1x128xf32> to vector<32x128xf32>
    %50 = arith.addf %48, %49 : vector<32x128xf32>
    %cst_48 = arith.constant 0.000000e+00 : f32
    %51 = vector.broadcast %cst_48 : f32 to vector<32x128xf32>
    %52 = arith.maximumf %50, %51 : vector<32x128xf32>
    %c0_49 = arith.constant 0 : index
    %c0_50 = arith.constant 0 : index
    %53 = vector.load %arg7[%c0_49, %c0_50] : memref<32x128xf32, #tpu.memory_space<vmem>>, vector<32x128xf32>
    tpu.vector_store %arg7[%c0_49, %c0_50], %52 {strides = array<i32>} : memref<32x128xf32, #tpu.memory_space<vmem>>, vector<32x128xf32>,
    return
  }
  func.func @transform_0(%arg0: i32) -> (i32, i32, i32) {
    %c0_i32 = arith.constant 0 : i32
    %c0_i32_0 = arith.constant 0 : i32
    %c0_i32_1 = arith.constant 0 : i32
    %c0_i32_2 = arith.constant 0 : i32
    return %c0_i32, %c0_i32_0, %c0_i32_1 : i32, i32, i32
  }
  func.func @transform_1(%arg0: i32) -> (i32, i32) {
    %c0_i32 = arith.constant 0 : i32
    %c0_i32_0 = arith.constant 0 : i32
    %c0_i32_1 = arith.constant 0 : i32
    return %c0_i32, %c0_i32_0 : i32, i32
  }
  func.func @transform_2(%arg0: i32) -> (i32, i32) {
    %c0_i32 = arith.constant 0 : i32
    %c0_i32_0 = arith.constant 0 : i32
    %c0_i32_1 = arith.constant 0 : i32
    return %c0_i32, %c0_i32_0 : i32, i32
  }
  func.func @transform_3(%arg0: i32) -> (i32, i32) {
    %c0_i32 = arith.constant 0 : i32
    %c0_i32_0 = arith.constant 0 : i32
    %c0_i32_1 = arith.constant 0 : i32
    return %c0_i32, %c0_i32_0 : i32, i32
  }
  func.func @transform_4(%arg0: i32) -> (i32, i32) {
    %c0_i32 = arith.constant 0 : i32
    %c0_i32_0 = arith.constant 0 : i32
    %c0_i32_1 = arith.constant 0 : i32
    return %c0_i32, %c0_i32_0 : i32, i32
  }
  func.func @transform_5(%arg0: i32) -> (i32, i32) {
    %c0_i32 = arith.constant 0 : i32
    %c0_i32_0 = arith.constant 0 : i32
    %c0_i32_1 = arith.constant 0 : i32
    return %c0_i32, %c0_i32_0 : i32, i32
  }
  func.func @transform_6(%arg0: i32) -> (i32, i32) {
    %c0_i32 = arith.constant 0 : i32
    %c0_i32_0 = arith.constant 0 : i32
    %c0_i32_1 = arith.constant 0 : i32
    return %c0_i32, %c0_i32_0 : i32, i32
  }
}

</mosaic_0001>

<bundles_post_ra>
// kernel: tpu_custom_call.1
= control target key start
LH: loop header
LB: loop body
LE: loop exit
PB: predicated region body
PF: predicated region fallthrough
CT: control target
= control target key end

     0   :  { %11 = vsyncpa [#allocation4], 0  ;;  %s1281_s0 = inlined_call_operand.vmem [shape: f32[2,16,64], index: 0, kind: input, shape index: {}]   ;;  %s1282_s1 = inlined_call_operand.hbm [shape: f32[216,128], index: 1, kind: input, shape index: {}]   ;;  %s1283_s2 = inlined_call_operand.vmem [shape: f32[1,8], index: 2, kind: input, shape index: {}]   ;;  %s1284_s3 = inlined_call_operand.vmem [shape: f32[1,8], index: 3, kind: input, shape index: {}]   ;;  %s1285_s4 = inlined_call_operand.vmem [shape: f32[128,8], index: 4, kind: input, shape index: {}]   ;;  %s1286_s5 = inlined_call_operand.vmem [shape: f32[8,128], index: 5, kind: input, shape index: {}]   ;;  %s1287_s6 = inlined_call_operand.hbm [shape: f32[32,128], index: 6, kind: output, shape index: {}]  }
   0x1   :  { %12 = vsyncpa [#allocation5], 0  ;;  %s1010_s21 = smov [#allocation3]   ;;  %s962_s25 = scalar_lea.hbm %s1282_s1, 3456 }
   0x2   :  { %s20_s22 = sshll.u32 %s1010_s21, 4  ;;  %p963_p0 = scmp.ne.s32.totalorder %s1282_s1, %s962_s25  ;;  %s21_s22 = int_to_ptr.vmem [resolvable:$true] %s20_s22 }
   0x3   :  { %p966_p1 = scmp.lt.u32.totalorder %s962_s25, %s1282_s1 }
   0x5   :  { %p968_p2 = pnand %p966_p1, %p963_p0 }
   0x7   :  { %971 = shalt.err (!%p968_p2)
}
   0x8   :  { %s972_s30 = scalar_lea.vmem %s21_s22, 3456  ;;  %p977_p4 = scmp.lt.s32.totalorder %s21_s22, %s21_s22 }
   0x9   :  { %p973_p3 = scmp.ne.s32.totalorder %s21_s22, %s972_s30  ;;  %p978_p5 = scmp.lt.s32.totalorder %s972_s30, %s972_s30 }
   0xb   :  { %p979_p6 = por %p978_p5, %p977_p4 }
   0xd   :  { %p980_p7 = pnand %p979_p6, %p973_p3 }
   0xf   :  { %983 = shalt.err (!%p980_p7)
}
  0x10   :  { %s1011_s7 = smov 128   ;;  %s1012_s8 = smov 8  }
  0x11   :  { %26 = dma.hbm_to_vmem [thread:$0]  %s1282_s1, 3456, %s21_s22, [#allocation4], %s1011_s7, %s1011_s7, %s1012_s8  }
  0x12   :  { %1006 = dma.done.wait [#allocation4], 3456  }
  0x13   :  { %1007 = vsyncadd [#allocation4], 4294963840  ;;  %v1013_v0 = vmov 0.0|0.0   ;;  %vm39_vm0 = vcmask 719872   ;;  %v1014_v1 = vmov 0.0   ;;  %v81_v2 = vld [vmem:[%s1281_s0 + $0x1] sm:$0xff] }
  0x14   :  { %863 = vmatprep.subr.bf16.mxu0 %v1013_v0  ;;  %902 = vmatprep.subr.bf16.mxu1 %v1013_v0  ;;  %40 = vst.msk [vmem:[#allocation2 + $0x8] sm:$0xff] %vm39_vm0, %v1014_v1  ;;  %38 = vst [vmem:[#allocation2] sm:$0xff] %v1014_v1  ;;  %v65_v3 = vld [vmem:[%s1281_s0] sm:$0xff]  ;;  %s1015_s14 = smov 20   ;;  %s1016_s15 = smov 76   ;;  %v66_v7 = vld [vmem:[%s1281_s0 + $0x8] sm:$0xff] }
  0x15   :  { %41 = vst [vmem:[#allocation2 + $0x10] sm:$0xff] %v1014_v1  ;;  %42 = vst.msk [vmem:[#allocation2 + $0x18] sm:$0xff] %vm39_vm0, %v1014_v1  ;;  %85 = vrot.lane.b32.xlu1 %v81_v2, %s1015_s14  ;;  %69 = vrot.lane.b32.xlu0 %v65_v3, %s1016_s15  ;;  %v52_v4 = vrot.slane %v65_v3, 7  ;;  %v48_v5 = vld [vmem:[%s1281_s0 + $0x8] sm:$0x7f]  ;;  %v145_v6 = vld [vmem:[#allocation3] sm:$0xff] }
  0x16   :  { %43 = vst [vmem:[#allocation2 + $0x20] sm:$0xff] %v1014_v1  ;;  %44 = vst.msk [vmem:[#allocation2 + $0x28] sm:$0xff] %vm39_vm0, %v1014_v1  ;;  %v53_v8 = vrot.slane %v48_v5, 7  ;;  %vm51_vm1 = vcmask 1040384   ;;  %v146_v9 = vld [vmem:[#allocation3 + $0x8] sm:$0xff]  ;;  %v147_v11 = vld [vmem:[#allocation3 + $0x10] sm:$0xff] }
  0x17   :  { %45 = vst [vmem:[#allocation2 + $0x30] sm:$0xff] %v1014_v1  ;;  %46 = vst.msk [vmem:[#allocation2 + $0x38] sm:$0xff] %vm39_vm0, %v1014_v1  ;;  %v864_v10 = vpack.c.bf16 %v146_v9, %v145_v6  ;;  %v148_v12 = vld [vmem:[#allocation3 + $0x18] sm:$0xff]  ;;  %s1017_s20 = smov 4   ;;  %v82_v13 = vld [vmem:[%s1281_s0 + $0x9] sm:$0x7f] }
  0x18   :  { %v54_v14 = vsel %vm51_vm1, %v52_v4, %v53_v8  ;;  %v725_v15 = vld [vmem:[%s1281_s0 + $0x10] sm:$0xff]  ;;  %v867_v16 = vpack.c.bf16 %v148_v12, %v147_v11  ;;  %v149_v17 = vld [vmem:[#allocation3 + $0x20] sm:$0xff]  ;;  %v150_v18 = vld [vmem:[#allocation3 + $0x28] sm:$0xff]  ;;  %vm77_vm2 = vcmask 97280   ;;  %vm91_vm3 = vcmask 687264  }
  0x19   :  { %71 = vrot.lane.b32.xlu1 %v66_v7, %s1016_s15  ;;  %55 = vrot.lane.b32.xlu0 %v52_v4, %s1017_s20  ;;  %v100_v19 = vrot.slane %v725_v15, 7  ;;  %v870_v20 = vpack.c.bf16 %v150_v18, %v149_v17  ;;  %v726_v21 = vld [vmem:[%s1281_s0 + $0x18] sm:$0x7f]  ;;  %v151_v22 = vld [vmem:[#allocation3 + $0x30] sm:$0xff]  ;;  %v153_v28 = vld [vmem:[#allocation3 + $0x40] sm:$0xff]  ;;  %vm61_vm4 = vcmask 556065  }
  0x1a   :  { %865 = vmatpush1.bf16.msra.mxu0 %v864_v10  ;;  %v152_v23 = vld [vmem:[#allocation3 + $0x38] sm:$0xff]  ;;  %v101_v26 = vrot.slane %v726_v21, 7  ;;  %v154_v29 = vld [vmem:[#allocation3 + $0x48] sm:$0xff]  ;;  %v155_v33 = vld [vmem:[#allocation3 + $0x50] sm:$0xff]  ;;  %vm75_vm5 = vcmask 1048160   ;;  %vm93_vm6 = vcmask 686240  }
  0x1b   :  { %866 = vmatprep.subr.bf16.mxu0 %v1013_v0  ;;  %v728_v24 = vld [vmem:[%s1281_s0 + $0x18] sm:$0xff]  ;;  %v873_v27 = vpack.c.bf16 %v152_v23, %v151_v22  ;;  %v876_v32 = vpack.c.bf16 %v154_v29, %v153_v28  ;;  %v157_v36 = vld [vmem:[#allocation3 + $0x60] sm:$0xff]  ;;  %v158_v37 = vld [vmem:[#allocation3 + $0x68] sm:$0xff]  ;;  %vm63_vm7 = vcmask 556064   ;;  %vm1018_vm8 = vmmov 0  }
  0x1c   :  { %v729_v25 = vld [vmem:[%s1281_s0 + $0x11] sm:$0xff]  ;;  %v730_v30 = vld [vmem:[%s1281_s0 + $0x19] sm:$0x7f]  ;;  %v102_v31 = vsel %vm51_vm1, %v100_v19, %v101_v26  ;;  %v882_v38 = vpack.c.bf16 %v158_v37, %v157_v36  ;;  %v161_v42 = vld [vmem:[#allocation3 + $0x80] sm:$0xff]  ;;  %810 = vmatprep.mubr.msk.f32.mxu1 %vm1018_vm8, %v1014_v1  ;;  %vm367_vm9 = vcmask 64512  }
  0x1d   :  { %87 = vrot.lane.b32.xlu1 %v82_v13, %s1015_s14  ;;  %57 = vrot.lane.b32.xlu0 %v54_v14, %s1017_s20  ;;  %v156_v34 = vld [vmem:[#allocation3 + $0x58] sm:$0xff]  ;;  %v159_v39 = vld [vmem:[#allocation3 + $0x70] sm:$0xff]  ;;  %v162_v43 = vld [vmem:[#allocation3 + $0x88] sm:$0xff] }
  0x1e   :  { %868 = vmatpush1.bf16.msra.mxu0 %v867_v16  ;;  %v879_v35 = vpack.c.bf16 %v156_v34, %v155_v33  ;;  %v160_v40 = vld [vmem:[#allocation3 + $0x78] sm:$0xff]  ;;  %v888_v44 = vpack.c.bf16 %v162_v43, %v161_v42  ;;  %v163_v45 = vld [vmem:[#allocation3 + $0x90] sm:$0xff]  ;;  %v165_v48 = vld [vmem:[#allocation3 + $0xa0] sm:$0xff] }
  0x1f   :  { %869 = vmatprep.subr.bf16.mxu0 %v1013_v0  ;;  %v885_v41 = vpack.c.bf16 %v160_v40, %v159_v39  ;;  %v164_v46 = vld [vmem:[#allocation3 + $0x98] sm:$0xff]  ;;  %v166_v49 = vld [vmem:[#allocation3 + $0xa8] sm:$0xff]  ;;  %v167_v51 = vld [vmem:[#allocation3 + $0xb0] sm:$0xff] }
  0x20   :  { %v891_v47 = vpack.c.bf16 %v164_v46, %v163_v45  ;;  %v894_v50 = vpack.c.bf16 %v166_v49, %v165_v48  ;;  %v168_v52 = vld [vmem:[#allocation3 + $0xb8] sm:$0xff]  ;;  %v169_v54 = vld [vmem:[#allocation3 + $0xc0] sm:$0xff]  ;;  %v170_v55 = vld [vmem:[#allocation3 + $0xc8] sm:$0xff] }
  0x21   :  { %103 = vrot.lane.b32.xlu1 %v100_v19, %s1017_s20  ;;  %115 = vrot.lane.b32.xlu0 %v725_v15, %s1016_s15  ;;  %v897_v53 = vpack.c.bf16 %v168_v52, %v167_v51  ;;  %v900_v56 = vpack.c.bf16 %v170_v55, %v169_v54  ;;  %v171_v57 = vld [vmem:[#allocation3 + $0xd0] sm:$0xff]  ;;  %v269_v16 = vld [vmem:[%s1285_s4] sm:$0xff]  ;;  %v270_v17 = vld [vmem:[%s1285_s4 + $0x8] sm:$0xff] }
  0x22   :  { %871 = vmatpush1.bf16.msra.mxu0 %v870_v20  ;;  %v1168_v18 = vpack.c.bf16 %v270_v17, %v269_v16  ;;  %v271_v19 = vld [vmem:[%s1285_s4 + $0x10] sm:$0xff]  ;;  %v272_v20 = vld [vmem:[%s1285_s4 + $0x18] sm:$0xff]  ;;  %v273_v22 = vld [vmem:[%s1285_s4 + $0x20] sm:$0xff] }
  0x23   :  { %872 = vmatprep.subr.bf16.mxu0 %v1013_v0  ;;  %v1178_v21 = vpack.c.bf16 %v272_v20, %v271_v19  ;;  %v274_v23 = vld [vmem:[%s1285_s4 + $0x28] sm:$0xff]  ;;  %v276_v26 = vld [vmem:[%s1285_s4 + $0x38] sm:$0xff]  ;;  %v277_v28 = vld [vmem:[%s1285_s4 + $0x40] sm:$0xff] }
  0x24   :  { %904 = vmatpush3.bf16.msra.mxu1 %v1168_v18  ;;  %v278_v29 = vld [vmem:[%s1285_s4 + $0x48] sm:$0xff]  ;;  %v281_v34 = vld [vmem:[%s1285_s4 + $0x60] sm:$0xff]  ;;  %v283_v37 = vld [vmem:[%s1285_s4 + $0x70] sm:$0xff] }
  0x25   :  { %117 = vrot.lane.b32.xlu1 %v728_v24, %s1016_s15  ;;  %129 = vrot.lane.b32.xlu0 %v729_v25, %s1015_s14  ;;  %v1188_v24 = vpack.c.bf16 %v274_v23, %v273_v22  ;;  %v275_v25 = vld [vmem:[%s1285_s4 + $0x30] sm:$0xff]  ;;  %v1234_v40 = vld [vmem:[%s1286_s5] sm:$0xff] }
  0x26   :  { %874 = vmatpush1.bf16.msra.mxu0 %v873_v27  ;;  %905 = vmatprep.subr.bf16.mxu1 %v1013_v0  ;;  %v912_v27 = vpack.c.bf16 %v276_v26, %v275_v25  ;;  %v533_v26 = vld [vmem:[%s1283_s2] sm:$0x1] }
  0x27   :  { %875 = vmatprep.subr.bf16.mxu0 %v1013_v0 }
  0x28   :  { %907 = vmatpush3.bf16.msra.mxu1 %v1178_v21 }
  0x29   :  { %131 = vrot.lane.b32.xlu1 %v730_v30, %s1015_s14  ;;  %105 = vrot.lane.b32.xlu0 %v102_v31, %s1017_s20  ;;  %v915_v30 = vpack.c.bf16 %v278_v29, %v277_v28  ;;  %v279_v31 = vld [vmem:[%s1285_s4 + $0x50] sm:$0xff] }
  0x2a   :  { %877 = vmatpush1.bf16.msra.mxu0 %v876_v32  ;;  %908 = vmatprep.subr.bf16.mxu1 %v1013_v0  ;;  %v280_v32 = vld [vmem:[%s1285_s4 + $0x58] sm:$0xff] }
  0x2b   :  { %878 = vmatprep.subr.bf16.mxu0 %v1013_v0  ;;  %v918_v33 = vpack.c.bf16 %v280_v32, %v279_v31 }
  0x2c   :  { %910 = vmatpush3.bf16.msra.mxu1 %v1188_v24 }
  0x2d   :  { %911 = vmatprep.subr.bf16.mxu1 %v1013_v0 }
  0x2e   :  { %880 = vmatpush1.bf16.msra.mxu0 %v879_v35  ;;  %v282_v35 = vld [vmem:[%s1285_s4 + $0x68] sm:$0xff] }
  0x2f   :  { %881 = vmatprep.subr.bf16.mxu0 %v1013_v0  ;;  %v921_v36 = vpack.c.bf16 %v282_v35, %v281_v34 }
  0x30   :  { %913 = vmatpush3.bf16.msra.mxu1 %v912_v27 }
  0x31   :  { %914 = vmatprep.subr.bf16.mxu1 %v1013_v0 }
  0x32   :  { %883 = vmatpush1.bf16.msra.mxu0 %v882_v38  ;;  %v284_v38 = vld [vmem:[%s1285_s4 + $0x78] sm:$0xff] }
  0x33   :  { %884 = vmatprep.subr.bf16.mxu0 %v1013_v0  ;;  %v924_v39 = vpack.c.bf16 %v284_v38, %v283_v37 }
  0x34   :  { %916 = vmatpush3.bf16.msra.mxu1 %v915_v30 }
  0x35   :  { %917 = vmatprep.subr.bf16.mxu1 %v1013_v0 }
  0x36   :  { %886 = vmatpush1.bf16.msra.mxu0 %v885_v41 }
  0x37   :  { %887 = vmatprep.subr.bf16.mxu0 %v1013_v0 }
  0x38   :  { %919 = vmatpush3.bf16.msra.mxu1 %v918_v33 }
  0x39   :  { %920 = vmatprep.subr.bf16.mxu1 %v1013_v0 }
  0x3a   :  { %889 = vmatpush1.bf16.msra.mxu0 %v888_v44 }
  0x3b   :  { %890 = vmatprep.subr.bf16.mxu0 %v1013_v0 }
  0x3c   :  { %922 = vmatpush3.bf16.msra.mxu1 %v921_v36 }
  0x3d   :  { %923 = vmatprep.subr.bf16.mxu1 %v1013_v0 }
  0x3e   :  { %892 = vmatpush1.bf16.msra.mxu0 %v891_v47 }
  0x3f   :  { %893 = vmatprep.subr.bf16.mxu0 %v1013_v0 }
  0x40   :  { %925 = vmatpush3.bf16.msra.mxu1 %v924_v39 }
  0x41   :  { %813 = vmatprep.subr.mxu1 %v1014_v1 }
  0x42   :  { %895 = vmatpush1.bf16.msra.mxu0 %v894_v50 }
  0x43   :  { %896 = vmatprep.subr.bf16.mxu0 %v1013_v0 }
  0x46   :  { %898 = vmatpush1.bf16.msra.mxu0 %v897_v53 }
  0x47   :  { %899 = vmatprep.subr.bf16.mxu0 %v1013_v0 }
  0x4a   :  { %901 = vmatpush1.bf16.msra.mxu0 %v900_v56 }
  0x4b   :  { %236 = vmatprep.subr.mxu0 %v1014_v1 }
  0x4e   :  { %237 = vmatpush1.msra.mxu0 %v171_v57 }
  0x4f   :  { %853 = vmatprep.subr.mxu0 %v1014_v1 }
  0x87   :  { %v86_v58 = vpop.permute.xlu1 %85  ;;  %v70_v59 = vpop.permute.xlu0 %69 }
  0x88   :  { %78 = vst.msk [vmem:[#allocation2 + $0x8] sm:$0xff] %vm77_vm2, %v70_v59 }
  0x89   :  { %92 = vst.msk [vmem:[#allocation2 + $0x8] sm:$0xff] %vm91_vm3, %v86_v58 }
  0x8b   :  { %v72_v60 = vpop.permute.xlu1 %71  ;;  %v56_v61 = vpop.permute.xlu0 %55 }
  0x8c   :  { %80 = vst.msk [vmem:[#allocation2 + $0x18] sm:$0xff] %vm77_vm2, %v72_v60 }
  0x8d   :  { %62 = vst.msk [vmem:[#allocation2] sm:$0xfe] %vm61_vm4, %v56_v61  ;;  %v441_v61 = vlaneseq }
  0x8e   :  { %76 = vst.msk [vmem:[#allocation2] sm:$0xff] %vm75_vm5, %v70_v59 }
  0x8f   :  { %v88_v62 = vpop.permute.xlu1 %87  ;;  %v58_v63 = vpop.permute.xlu0 %57 }
  0x90   :  { %94 = vst.msk [vmem:[#allocation2 + $0x18] sm:$0x7f] %vm93_vm6, %v88_v62  ;;  %v138_v2 = vld [vmem:[#allocation2 + $0x8] sm:$0xff]  ;;  %v442_v62 = vshrl.u32 %v441_v61, 7 }
  0x91   :  { %64 = vst.msk [vmem:[#allocation2 + $0x10] sm:$0xff] %vm63_vm7, %v58_v63  ;;  %731 = vmatprep.mubr.msk.f32.mxu0 %vm39_vm0, %v138_v2 }
  0x92   :  { %79 = vst.msk [vmem:[#allocation2 + $0x10] sm:$0xff] %vm75_vm5, %v72_v60  ;;  %v443_v63 = vsub.s32 0, %v442_v62 }
  0x93   :  { %v104_v3 = vpop.permute.xlu1 %103  ;;  %v116_v4 = vpop.permute.xlu0 %115 }
  0x94   :  { %109 = vst.msk [vmem:[#allocation2 + $0x20] sm:$0xfe] %vm61_vm4, %v104_v3 }
  0x95   :  { %122 = vst.msk [vmem:[#allocation2 + $0x28] sm:$0xff] %vm77_vm2, %v116_v4  ;;  %v137_v5 = vld [vmem:[#allocation2] sm:$0xff] }
  0x96   :  { %121 = vst.msk [vmem:[#allocation2 + $0x20] sm:$0xff] %vm75_vm5, %v116_v4  ;;  %249 = vmatmul.mubr.f32.vlgmr.msra.gmra.mrb[0].mxu0 %v137_v5 }
  0x97   :  { %v118_v6 = vpop.permute.xlu1 %117  ;;  %v130_v7 = vpop.permute.xlu0 %129  ;;  %v140_v8 = vld [vmem:[#allocation2 + $0x18] sm:$0xff]  ;;  %854 = vmatpush3.msra.mxu0 %v1234_v40 }
  0x98   :  { %124 = vst.msk [vmem:[#allocation2 + $0x38] sm:$0xff] %vm77_vm2, %v118_v6  ;;  %732 = vmatprep.mubr.msk.f32.mxu0 %vm39_vm0, %v140_v8 }
  0x99   :  { %135 = vst.msk [vmem:[#allocation2 + $0x28] sm:$0xff] %vm91_vm3, %v130_v7  ;;  %v139_v9 = vld [vmem:[#allocation2 + $0x10] sm:$0xff] }
  0x9a   :  { %254 = vmatmul.mubr.f32.gmra.mrb[2].mxu0 %v139_v9 }
  0x9b   :  { %v132_v10 = vpop.permute.xlu1 %131  ;;  %v106_v11 = vpop.permute.xlu0 %105 }
  0x9c   :  { %136 = vst.msk [vmem:[#allocation2 + $0x38] sm:$0x7f] %vm93_vm6, %v132_v10 }
  0x9d   :  { %110 = vst.msk [vmem:[#allocation2 + $0x30] sm:$0xff] %vm63_vm7, %v106_v11  ;;  %v141_v13 = vld [vmem:[#allocation2 + $0x20] sm:$0xff] }
  0x9e   :  { %123 = vst.msk [vmem:[#allocation2 + $0x30] sm:$0xff] %vm75_vm5, %v118_v6 }
  0xa0   :  { %v142_v12 = vld [vmem:[#allocation2 + $0x28] sm:$0xff] }
  0xa1   :  { %733 = vmatprep.mubr.msk.f32.mxu0 %vm39_vm0, %v142_v12 }
  0xa2   :  { %259 = vmatmul.mubr.f32.gmra.mrb[4].mxu0 %v141_v13 }
  0xa3   :  { %v144_v14 = vld [vmem:[#allocation2 + $0x38] sm:$0xff] }
  0xa4   :  { %734 = vmatprep.mubr.msk.f32.mxu0 %vm39_vm0, %v144_v14 }
  0xa5   :  { %v143_v15 = vld [vmem:[#allocation2 + $0x30] sm:$0xff] }
  0xa6   :  { %264 = vmatmul.mubr.f32.gmra.mrb[6].mxu0 %v143_v15 }
  0xa7   :  { %855 = vmatprep.mubr.msk.f32.mxu0 %vm1018_vm8, %v1014_v1 }
 0x169   :  { %v250_v41 = vpop.f32.mrb[0].mxu0 }
 0x16a   :  { %v252_v42 = vpop.f32.mrb[1].mxu0 }
 0x16d   :  { %v255_v43 = vpop.f32.mrb[2].mxu0 }
 0x16e   :  { %v286_v44 = vadd.f32 %v255_v43, %v250_v41  ;;  %v257_v45 = vpop.f32.mrb[3].mxu0 }
 0x175   :  { %v260_v46 = vpop.f32.mrb[4].mxu0 }
 0x176   :  { %v287_v47 = vadd.f32 %v286_v44, %v260_v46  ;;  %v262_v48 = vpop.f32.mrb[5].mxu0 }
 0x179   :  { %v265_v49 = vpop.f32.mrb[6].mxu0 }
 0x17a   :  { %v288_v50 = vadd.f32 %v287_v47, %v265_v49  ;;  %v267_v51 = vpop.f32.mrb[7].mxu0 }
 0x17c   :  { %v289_v52 = vrot.slane %v288_v50, 4 }
 0x17e   :  { %v290_v53 = vadd.f32 %v289_v52, %v288_v50 }
 0x180   :  { %v291_v54 = vrot.slane %v290_v53, 2 }
 0x182   :  { %v292_v55 = vadd.f32 %v291_v54, %v290_v53 }
 0x184   :  { %v293_v56 = vrot.slane %v292_v55, 1 }
 0x186   :  { %v294_v57 = vadd.f32 %v293_v56, %v292_v55 }
 0x188   :  { %811 = vmatmul.mubr.f32.vlgmr.msra.gmra.mrb[0].mxu1 %v294_v57 }
 0x189   :  { %814 = vmatpush3.msra.mxu1 %v1234_v40  ;;  %815 = vmatprep.mubr.msk.f32.mxu1 %vm1018_vm8, %v1014_v1 }
 0x18a   :  { %926 = vmatprep.subr.bf16.mxu1 %v1013_v0 }
 0x25b   :  { %v361_v58 = vpop.f32.mrb[0].mxu1 }
 0x25c   :  { %v366_v59 = vmul.f32 0.001953125, %v361_v58  ;;  %v812_v60 = vpop.f32.mrb[1].mxu1 }
 0x25e   :  { %816 = vmatmul.mubr.msk.f32.vlgmr.msra.gmra.mrb[2].mxu1 %vm367_vm9, %v366_v59 }
 0x25f   :  { %928 = vmatpush3.bf16.msra.mxu1 %v1168_v18  ;;  %850 = vmatprep.mubr.msk.f32.mxu1 %vm1018_vm8, %v1014_v1 }
 0x260   :  { %929 = vmatprep.subr.bf16.mxu1 %v1013_v0 }
 0x263   :  { %931 = vmatpush3.bf16.msra.mxu1 %v1178_v21  ;;  %v610_v21 = vld [vmem:[%s1284_s3] sm:$0x1]  ;;  %s1019_s3 = smov [#allocation6]  }
 0x264   :  { %932 = vmatprep.subr.bf16.mxu1 %v1013_v0  ;;  %s713_s21 = sshll.u32 %s1019_s3, 4  ;;  %s714_s21 = int_to_ptr.vmem [resolvable:$true] %s713_s21 }
 0x265   :  { %s984_s2 = scalar_lea.vmem %s714_s21, 512  ;;  %p989_p9 = scmp.lt.s32.totalorder %s714_s21, %s714_s21 }
 0x266   :  { %p985_p8 = scmp.ne.s32.totalorder %s714_s21, %s984_s2  ;;  %p990_p10 = scmp.lt.s32.totalorder %s984_s2, %s984_s2 }
 0x267   :  { %934 = vmatpush3.bf16.msra.mxu1 %v1188_v24 }
 0x268   :  { %935 = vmatprep.subr.bf16.mxu1 %v1013_v0  ;;  %p991_p11 = por %p990_p10, %p989_p9 }
 0x26a   :  { %p992_p12 = pnand %p991_p11, %p985_p8 }
 0x26b   :  { %937 = vmatpush3.bf16.msra.mxu1 %v912_v27 }
 0x26c   :  { %938 = vmatprep.subr.bf16.mxu1 %v1013_v0 }
 0x26f   :  { %940 = vmatpush3.bf16.msra.mxu1 %v915_v30 }
 0x270   :  { %941 = vmatprep.subr.bf16.mxu1 %v1013_v0 }
 0x273   :  { %943 = vmatpush3.bf16.msra.mxu1 %v918_v33 }
 0x274   :  { %944 = vmatprep.subr.bf16.mxu1 %v1013_v0 }
 0x277   :  { %946 = vmatpush3.bf16.msra.mxu1 %v921_v36 }
 0x278   :  { %947 = vmatprep.subr.bf16.mxu1 %v1013_v0 }
 0x27b   :  { %949 = vmatpush3.bf16.msra.mxu1 %v924_v39 }
 0x27c   :  { %858 = vmatprep.subr.mxu1 %v1014_v1 }
 0x331   :  { %v437_v2 = vpop.f32.mrb[2].mxu1 }
 0x332   :  { %v444_v3 = vrot.slane %v437_v2, %v443_v63  ;;  %v817_v4 = vpop.f32.mrb[3].mxu1 }
 0x334   :  { %v445_v5 = vsub.f32 %v250_v41, %v444_v3  ;;  %v446_v6 = vsub.f32 %v255_v43, %v444_v3  ;;  %v447_v7 = vsub.f32 %v260_v46, %v444_v3  ;;  %v448_v8 = vsub.f32 %v265_v49, %v444_v3 }
 0x336   :  { %v449_v9 = vmul.f32 %v445_v5, %v445_v5  ;;  %v450_v10 = vmul.f32 %v446_v6, %v446_v6  ;;  %v451_v11 = vmul.f32 %v447_v7, %v447_v7  ;;  %v452_v13 = vmul.f32 %v448_v8, %v448_v8 }
 0x338   :  { %v453_v12 = vadd.f32 %v450_v10, %v449_v9 }
 0x33a   :  { %v454_v14 = vadd.f32 %v453_v12, %v451_v11 }
 0x33c   :  { %v455_v0 = vadd.f32 %v454_v14, %v452_v13 }
 0x33e   :  { %v456_v15 = vrot.slane %v455_v0, 4 }
 0x340   :  { %v457_v16 = vadd.f32 %v456_v15, %v455_v0 }
 0x342   :  { %v458_v17 = vrot.slane %v457_v16, 2 }
 0x344   :  { %v459_v18 = vadd.f32 %v458_v17, %v457_v16 }
 0x346   :  { %v460_v19 = vrot.slane %v459_v18, 1 }
 0x348   :  { %v461_v20 = vadd.f32 %v460_v19, %v459_v18 }
 0x34a   :  { %851 = vmatmul.mubr.f32.vlgmr.msra.gmra.mrb[4].mxu1 %v461_v20 }
 0x34b   :  { %859 = vmatpush3.msra.mxu1 %v1234_v40  ;;  %860 = vmatprep.mubr.msk.f32.mxu1 %vm1018_vm8, %v1014_v1 }
 0x34e   :  { %861 = vmatmul.mubr.msk.f32.vlgmr.msra.gmra.mrb[6].mxu1 %vm367_vm9, %v610_v21 }
 0x41d   :  { %v528_v22 = vpop.f32.mrb[4].mxu1 }
 0x41e   :  { %v532_v23 = vmul.f32 0.001953125, %v528_v22  ;;  %v852_v24 = vpop.f32.mrb[5].mxu1 }
 0x420   :  { %v534_v25 = vadd.f32 1e-05, %v532_v23 }
 0x421   :  { %v680_v1 = vpop.f32.mrb[6].mxu1 }
 0x422   :  { %960 = vrsqrt.f32 %v534_v25  ;;  %v862_v29 = vpop.f32.mrb[7].mxu1  ;;  %v695_v33 = vrot.slane %v680_v1, %v443_v63 }
 0x42c   :  { %v961_v27 = vpop.eup %960 }
 0x42d   :  { %v536_v28 = vmul.f32 %v961_v27, %v533_v26 }
 0x42f   :  { %856 = vmatmul.mubr.msk.f32.vlgmr.msra.gmra.mrb[8].mxu0 %vm367_vm9, %v536_v28 }
 0x502   :  { %v606_v30 = vpop.f32.mrb[8].mxu0 }
 0x503   :  { %v687_v31 = vrot.slane %v606_v30, %v443_v63  ;;  %v857_v32 = vpop.f32.mrb[9].mxu0 }
 0x505   :  { %v688_v34 = vmul.f32 %v687_v31, %v445_v5  ;;  %v689_v35 = vmul.f32 %v687_v31, %v446_v6  ;;  %v690_v36 = vmul.f32 %v687_v31, %v447_v7  ;;  %v691_v37 = vmul.f32 %v687_v31, %v448_v8 }
 0x507   :  { %v696_v38 = vadd.f32 %v695_v33, %v688_v34  ;;  %v697_v39 = vadd.f32 %v695_v33, %v689_v35  ;;  %v698_v40 = vadd.f32 %v695_v33, %v690_v36  ;;  %v699_v41 = vadd.f32 %v695_v33, %v691_v37 }
 0x509   :  { %v700_v42 = vmax.f32 %v696_v38, 0.0  ;;  %v701_v43 = vmax.f32 %v697_v39, 0.0  ;;  %v702_v44 = vmax.f32 %v698_v40, 0.0  ;;  %v703_v45 = vmax.f32 %v699_v41, 0.0 }
 0x50b   :  { %704 = vst [vmem:[#allocation6] sm:$0xff] %v700_v42  ;;  %705 = vst [vmem:[#allocation6 + $0x8] sm:$0xff] %v701_v43 }
 0x50c   :  { %706 = vst [vmem:[#allocation6 + $0x10] sm:$0xff] %v702_v44  ;;  %707 = vst [vmem:[#allocation6 + $0x18] sm:$0xff] %v703_v45 }
 0x50d   :  { %995 = shalt.err (!%p992_p12)
}
 0x50e   :  { %s996_s24 = scalar_lea.hbm %s1287_s6, 512 }
 0x50f   :  { %p997_p13 = scmp.ne.s32.totalorder %s1287_s6, %s996_s24  ;;  %p1000_p0 = scmp.lt.u32.totalorder %s996_s24, %s1287_s6 }
 0x511   :  { %p1002_p1 = pnand %p1000_p0, %p997_p13 }
 0x513   :  { %1005 = shalt.err (!%p1002_p1)
}
 0x514   :  { %719 = dma.vmem_to_hbm [thread:$0]  %s714_s21, 512, %s1287_s6, [#allocation5], %s1011_s7, %s1011_s7, %s1012_s8  }
 0x515   :  { %1008 = dma.done.wait [#allocation5], 512  }
 0x516   :  { %1009 = vsyncadd [#allocation5], 4294966784 }
 0x517   :  { %723 = vsyncpa [#allocation4], 1 }
 0x518   :  { %724 = vsyncpa [#allocation5], 1 }

</bundles_post_ra>
